<compile_context>
chip_gen: v5e
topology: v5e:2x2
jax: 0.10.0
libtpu: 0.0.40
codegen_flags: <defaults>
</compile_context>

<pallas_src>
import functools

import jax
import jax.numpy as jnp
from jax.experimental import pallas as pl
from jax.experimental.pallas import tpu as pltpu

BN_EPS = 1e-5

_VMEM_LIMIT = 32 * 1024 * 1024          # safe on v5e/v6e (128 MiB) and v7x (64 MiB)
_TILE_BUDGET_BYTES = 8 * 1024 * 1024    # per-step activation blocks (pre double-buffer)
_FUSED_BYTES_LIMIT = 10 * 1024 * 1024   # whole-problem-in-VMEM threshold
_BF16_ACT_THRESHOLD = 64 * 1024 * 1024  # f32 activation traffic above this -> bf16 storage
_BF16_MXU_MIN_K = 256                   # bf16 MXU operands only when contraction dim >= this

_PARAMS_ACC = pltpu.CompilerParams(
    dimension_semantics=("parallel", "arbitrary"), vmem_limit_bytes=_VMEM_LIMIT)
_PARAMS_PAR = pltpu.CompilerParams(
    dimension_semantics=("parallel", "parallel"), vmem_limit_bytes=_VMEM_LIMIT)


# --------------------------------------------------------------------------- tiling

def _choose_tiling(V, col_bytes):
    """Lane-dense vertex tile sized from a VMEM budget; full V when it fits."""
    cap = (_TILE_BUDGET_BYTES // col_bytes) // 512 * 512
    cap = max(512, min(4096, cap))
    if V <= cap:
        return V, V                      # single full-extent tile, no padding
    return cap, pl.cdiv(V, cap) * cap


# ----------------------------------------------------------------- in-kernel helpers

def _accum_stats(h, sum_ref, ssq_ref, *, v_true, tile_v, need_mask):
    """Accumulate per-channel sum / sum-of-squares (f32) into the VMEM-resident
    (1, C, 1) output block.  Only the last V tile pays the padding mask."""
    j = pl.program_id(1)

    @pl.when(j == 0)
    def _():
        sum_ref[...] = jnp.zeros_like(sum_ref)
        ssq_ref[...] = jnp.zeros_like(ssq_ref)

    if need_mask:
        last = pl.num_programs(1) - 1

        @pl.when(j == last)
        def _():
            col = j * tile_v + jax.lax.broadcasted_iota(jnp.int32, (1, tile_v), 1)
            hm = jnp.where(col < v_true, h, 0.0)
            sum_ref[0] += jnp.sum(hm, axis=1, keepdims=True)
            ssq_ref[0] += jnp.sum(hm * h, axis=1, keepdims=True)

        @pl.when(j != last)
        def _():
            sum_ref[0] += jnp.sum(h, axis=1, keepdims=True)
            ssq_ref[0] += jnp.sum(h * h, axis=1, keepdims=True)
    else:
        sum_ref[0] += jnp.sum(h, axis=1, keepdims=True)
        ssq_ref[0] += jnp.sum(h * h, axis=1, keepdims=True)


# ------------------------------------------------------------------ tiled-path kernels

def _layer1_kernel(zp_ref, v_ref, w_ref, h_ref, sum_ref, ssq_ref,
                   *, v_true, tile_v, need_mask):
    """conv1 (k=1; bias dropped: cancelled by BN) on a lane-dense (C1, tile_v) slab."""
    v = v_ref[0]                                                      # (3, tile_v)
    h = jnp.dot(w_ref[...], v, preferred_element_type=jnp.float32) + zp_ref[0]
    h_ref[0] = h.astype(h_ref.dtype)
    _accum_stats(h, sum_ref, ssq_ref, v_true=v_true, tile_v=tile_v, need_mask=need_mask)


def _mid_kernel(h_ref, s_ref, t_ref, w_ref, o_ref, sum_ref, ssq_ref,
                *, v_true, tile_v, need_mask):
    """Folded BN (scale/shift, f32) + ReLU of previous layer, then next conv (k=1)."""
    h = h_ref[0].astype(jnp.float32)                                  # (C_in, tile_v)
    a = jnp.maximum(h * s_ref[...] + t_ref[...], 0.0)
    hn = jnp.dot(w_ref[...], a.astype(w_ref.dtype),
                 preferred_element_type=jnp.float32)                  # (C_out, tile_v)
    o_ref[0] = hn.astype(o_ref.dtype)
    _accum_stats(hn, sum_ref, ssq_ref, v_true=v_true, tile_v=tile_v, need_mask=need_mask)


def _final_kernel(h_ref, s_ref, t_ref, w_ref, b_ref, o_ref):
    """bn3 + ReLU, conv4 (+bias), tanh; writes the lane-dense (3, tile_v) output."""
    h = h_ref[0].astype(jnp.float32)
    a = jnp.maximum(h * s_ref[...] + t_ref[...], 0.0)
    o = jnp.dot(w_ref[...], a.astype(w_ref.dtype),
                preferred_element_type=jnp.float32) + b_ref[...]
    o_ref[0] = jnp.tanh(o).astype(o_ref.dtype)


# ------------------------------------------------------------------ fused-path kernel

def _fused_kernel(zp_ref, v_ref, w1_ref, w2_ref, w3_ref, w4_ref, b4_ref,
                  g1_ref, be1_ref, g2_ref, be2_ref, g3_ref, be3_ref, o_ref, *, B, n):
    """Whole forward in one kernel: all activations stay in VMEM (small problems)."""

    def bn_relu(hs, g, be):
        s = sum(jnp.sum(h, axis=1, keepdims=True) for h in hs)
        ss = sum(jnp.sum(h * h, axis=1, keepdims=True) for h in hs)
        mean = s / n
        var = jnp.maximum(ss / n - mean * mean, 0.0)       # biased var (training mode)
        scale = g * jax.lax.rsqrt(var + BN_EPS)
        shift = be - mean * scale
        return [jnp.maximum(h * scale + shift, 0.0) for h in hs]

    h1 = [jnp.dot(w1_ref[...], v_ref[b], preferred_element_type=jnp.float32) + zp_ref[b]
          for b in range(B)]
    a1 = bn_relu(h1, g1_ref[...], be1_ref[...])
    h2 = [jnp.dot(w2_ref[...], a, preferred_element_type=jnp.float32) for a in a1]
    a2 = bn_relu(h2, g2_ref[...], be2_ref[...])
    h3 = [jnp.dot(w3_ref[...], a, preferred_element_type=jnp.float32) for a in a2]
    a3 = bn_relu(h3, g3_ref[...], be3_ref[...])
    for b in range(B):
        o = jnp.dot(w4_ref[...], a3[b], preferred_element_type=jnp.float32) + b4_ref[...]
        o_ref[b] = jnp.tanh(o).astype(o_ref.dtype)


# ------------------------------------------------------------------- pallas_call glue

def _fold_bn(psum, pssq, n, gamma, beta):
    """Per-batch partial stats -> per-channel BN scale/shift (tiny JAX glue)."""
    total = jnp.sum(psum, axis=0)         # (C, 1)
    total_sq = jnp.sum(pssq, axis=0)      # (C, 1)
    mean = total / n
    var = jnp.maximum(total_sq / n - mean * mean, 0.0)
    scale = gamma * jax.lax.rsqrt(var + BN_EPS)
    shift = beta - mean * scale
    return scale, shift


def _run_layer1(zproj, verts, w1v, *, tile_v, v_true, need_mask, act_dtype):
    B, c1, _ = zproj.shape
    v_pad = verts.shape[2]
    n_v = v_pad // tile_v
    kern = functools.partial(_layer1_kernel, v_true=v_true, tile_v=tile_v,
                             need_mask=need_mask)
    return pl.pallas_call(
        kern,
        grid=(B, n_v),
        in_specs=[
            pl.BlockSpec((1, c1, 1), lambda b, j: (b, 0, 0)),
            pl.BlockSpec((1, 3, tile_v), lambda b, j: (b, 0, j)),
            pl.BlockSpec((c1, 3), lambda b, j: (0, 0)),
        ],
        out_specs=(
            pl.BlockSpec((1, c1, tile_v), lambda b, j: (b, 0, j)),
            pl.BlockSpec((1, c1, 1), lambda b, j: (b, 0, 0)),   # VMEM-resident over j
            pl.BlockSpec((1, c1, 1), lambda b, j: (b, 0, 0)),
        ),
        out_shape=(
            jax.ShapeDtypeStruct((B, c1, v_pad), act_dtype),
            jax.ShapeDtypeStruct((B, c1, 1), jnp.float32),
            jax.ShapeDtypeStruct((B, c1, 1), jnp.float32),
        ),
        compiler_params=_PARAMS_ACC,
    )(zproj, verts, w1v)


def _run_mid(h_in, scale, shift, w, *, tile_v, v_true, need_mask, act_dtype):
    B, c_in, v_pad = h_in.shape
    c_out = w.shape[0]
    n_v = v_pad // tile_v
    kern = functools.partial(_mid_kernel, v_true=v_true, tile_v=tile_v,
                             need_mask=need_mask)
    return pl.pallas_call(
        kern,
        grid=(B, n_v),
        in_specs=[
            pl.BlockSpec((1, c_in, tile_v), lambda b, j: (b, 0, j)),
            pl.BlockSpec((c_in, 1), lambda b, j: (0, 0)),
            pl.BlockSpec((c_in, 1), lambda b, j: (0, 0)),
            pl.BlockSpec((c_out, c_in), lambda b, j: (0, 0)),
        ],
        out_specs=(
            pl.BlockSpec((1, c_out, tile_v), lambda b, j: (b, 0, j)),
            pl.BlockSpec((1, c_out, 1), lambda b, j: (b, 0, 0)),
            pl.BlockSpec((1, c_out, 1), lambda b, j: (b, 0, 0)),
        ),
        out_shape=(
            jax.ShapeDtypeStruct((B, c_out, v_pad), act_dtype),
            jax.ShapeDtypeStruct((B, c_out, 1), jnp.float32),
            jax.ShapeDtypeStruct((B, c_out, 1), jnp.float32),
        ),
        compiler_params=_PARAMS_ACC,
    )(h_in, scale, shift, w)


def _run_final(h_in, scale, shift, w4, b4, *, tile_v):
    B, c_in, v_pad = h_in.shape
    n_v = v_pad // tile_v
    return pl.pallas_call(
        _final_kernel,
        grid=(B, n_v),
        in_specs=[
            pl.BlockSpec((1, c_in, tile_v), lambda b, j: (b, 0, j)),
            pl.BlockSpec((c_in, 1), lambda b, j: (0, 0)),
            pl.BlockSpec((c_in, 1), lambda b, j: (0, 0)),
            pl.BlockSpec((3, c_in), lambda b, j: (0, 0)),
            pl.BlockSpec((3, 1), lambda b, j: (0, 0)),
        ],
        out_specs=pl.BlockSpec((1, 3, tile_v), lambda b, j: (b, 0, j)),
        out_shape=jax.ShapeDtypeStruct((B, 3, v_pad), jnp.float32),
        compiler_params=_PARAMS_PAR,
    )(h_in, scale, shift, w4, b4)


def _run_fused(zproj, verts, w1v, params, *, B, V):
    kern = functools.partial(_fused_kernel, B=B, n=float(B * V))
    return pl.pallas_call(
        kern,
        out_shape=jax.ShapeDtypeStruct((B, 3, V), jnp.float32),
        compiler_params=pltpu.CompilerParams(vmem_limit_bytes=_VMEM_LIMIT),
    )(zproj, verts, w1v, params["w2"], params["w3"], params["w4"], params["b4"],
      params["g1"], params["be1"], params["g2"], params["be2"],
      params["g3"], params["be3"])


# -------------------------------------------------------------------------- wrapper

@functools.partial(jax.jit, static_argnames=("force_tiled",))
def point_gen_decoder(z, verts, params, force_tiled=False):
    """z: (B, L) f32, verts: (B, 3, V) f32 -> (B, 3, V) f32 (same layout as PyTorch)."""
    B, L = z.shape
    _, three, V = verts.shape
    assert three == 3
    c1 = params["w1"].shape[0]
    c2 = params["w2"].shape[0]
    c3 = params["w3"].shape[0]

    # conv1 weight: (C1, L+3), input-channel order = [latent | xyz] (torch.cat order).
    w1 = params["w1"]
    w1z, w1v = w1[:, :L], w1[:, L:]
    # Per-batch latent projection replaces the (B*V, L) repeated-z HBM slab.
    # conv1..conv3 biases are dropped (cancelled by training-mode BN mean subtraction).
    zproj = jnp.einsum("bl,cl->bc", z, w1z)[:, :, None]               # (B, C1, 1)

    fused_bytes = 4 * B * V * (6 + 2 * (c1 + c2 + c3))
    if (not force_tiled) and B <= 8 and fused_bytes <= _FUSED_BYTES_LIMIT:
        return _run_fused(zproj, verts, w1v, params, B=B, V=V)

    # ------------------------- tiled 4-pass path -------------------------
    act_dtype = (jnp.bfloat16
                 if 4 * B * V * (c1 + c2 + c3) > _BF16_ACT_THRESHOLD else jnp.float32)
    ai = jnp.dtype(act_dtype).itemsize

    # bf16 MXU operands only where the contraction dim is large enough to matter.
    w2 = params["w2"].astype(jnp.bfloat16) if c1 >= _BF16_MXU_MIN_K else params["w2"]
    w3 = params["w3"].astype(jnp.bfloat16) if c2 >= _BF16_MXU_MIN_K else params["w3"]
    w4 = params["w4"].astype(jnp.bfloat16) if c3 >= _BF16_MXU_MIN_K else params["w4"]

    col_bytes = max(3 * 4 + c1 * ai, (c1 + c2) * ai, (c2 + c3) * ai, c3 * ai + 3 * 4)
    tile_v, v_pad = _choose_tiling(V, col_bytes)
    need_mask = v_pad != V
    verts_p = jnp.pad(verts, ((0, 0), (0, 0), (0, v_pad - V))) if need_mask else verts

    n_true = B * V
    h1, p1, q1 = _run_layer1(zproj, verts_p, w1v, tile_v=tile_v, v_true=V,
                             need_mask=need_mask, act_dtype=act_dtype)
    s1, t1 = _fold_bn(p1, q1, n_true, params["g1"], params["be1"])

    h2, p2, q2 = _run_mid(h1, s1, t1, w2, tile_v=tile_v, v_true=V,
                          need_mask=need_mask, act_dtype=act_dtype)
    s2, t2 = _fold_bn(p2, q2, n_true, params["g2"], params["be2"])

    h3, p3, q3 = _run_mid(h2, s2, t2, w3, tile_v=tile_v, v_true=V,
                          need_mask=need_mask, act_dtype=act_dtype)
    s3, t3 = _fold_bn(p3, q3, n_true, params["g3"], params["be3"])

    out = _run_final(h3, s3, t3, w4, params["b4"], tile_v=tile_v)
    return out[:, :, :V] if need_mask else out


# -------------------------------------------------------------- params & reference

def init_params(key, latent_size):
    """Deterministic synthetic parameters (shapes match the nn.Module __init__).
    Weights are (C_out, C_in) like PyTorch Conv1d (k=1); per-channel vectors are (C, 1)."""
    c0 = latent_size // 1 + 3
    c1 = latent_size // 1 + 3
    c2 = latent_size // 2 + 3
    c3 = latent_size // 4 + 3
    ks = jax.random.split(key, 12)

    def w(k, cout, cin):
        return jax.random.normal(k, (cout, cin), jnp.float32) * 0.1

    def vec(k, c, scale):
        return scale * jax.random.normal(k, (c, 1), jnp.float32)

    return dict(
        w1=w(ks[0], c1, c0), b1=vec(ks[1], c1, 0.05),
        g1=1.0 + 0.1 * jax.random.normal(ks[2], (c1, 1), jnp.float32),
        be1=vec(ks[3], c1, 0.05),
        w2=w(ks[4], c2, c1), b2=vec(ks[5], c2, 0.05),
        g2=jnp.ones((c2, 1), jnp.float32), be2=jnp.zeros((c2, 1), jnp.float32),
        w3=w(ks[6], c3, c2), b3=vec(ks[7], c3, 0.05),
        g3=1.0 + 0.1 * jax.random.normal(ks[8], (c3, 1), jnp.float32),
        be3=vec(ks[9], c3, 0.05),
        w4=w(ks[10], 3, c3), b4=vec(ks[11], 3, 0.05),
    )


def reference(z, verts, params):
    """Pure-JAX reference matching the PyTorch forward (biases b1..b3 included;
    they are exactly cancelled by training-mode BN, which the kernel exploits)."""
    B, L = z.shape
    V = verts.shape[2]
    z_rep = jnp.broadcast_to(z[:, :, None], (B, L, V))
    y = jnp.concatenate([z_rep, verts], axis=1)                       # (B, L+3, V)

    def conv(y, w, b):
        return jnp.einsum("oc,bcv->bov", w, y) + b[None]

    def bn(y, g, be):
        m = jnp.mean(y, axis=(0, 2), keepdims=True)
        v = jnp.mean((y - m) ** 2, axis=(0, 2), keepdims=True)        # biased variance
        return (y - m) * jax.lax.rsqrt(v + BN_EPS) * g[None] + be[None]

    y = jax.nn.relu(bn(conv(y, params["w1"], params["b1"]), params["g1"], params["be1"]))
    y = jax.nn.relu(bn(conv(y, params["w2"], params["b2"]), params["g2"], params["be2"]))
    y = jax.nn.relu(bn(conv(y, params["w3"], params["b3"]), params["g3"], params["be3"]))
    return jnp.tanh(conv(y, params["w4"], params["b4"]))


if __name__ == "__main__":
    LATENT = 32
    key = jax.random.PRNGKey(0)
    kz, kv, kp, kv2 = jax.random.split(key, 4)
    params = init_params(kp, LATENT)

    # Small shapes -> fully-fused single-kernel path.
    B, V = 2, 16
    z = jax.random.normal(kz, (B, LATENT), jnp.float32)
    verts = jax.random.normal(kv, (B, 3, V), jnp.float32)
    out = jax.block_until_ready(point_gen_decoder(z, verts, params))
    assert out.shape == (B, 3, V), out.shape
    err = float(jnp.max(jnp.abs(out - reference(z, verts, params))))
    assert err < 2e-4, err

    # Larger vertex count -> tiled multi-pass path (exercises tiling, last-tile
    # padding mask, and the VMEM-resident BN-stat accumulation).
    B2, V2 = 2, 4500
    z2 = jax.random.normal(kz, (B2, LATENT), jnp.float32)
    verts2 = jax.random.normal(kv2, (B2, 3, V2), jnp.float32)
    out2 = jax.block_until_ready(point_gen_decoder(z2, verts2, params, force_tiled=True))
    assert out2.shape == (B2, 3, V2), out2.shape
    err2 = float(jnp.max(jnp.abs(out2 - reference(z2, verts2, params))))
    assert err2 < 1e-3, err2

    print("KERNEL_OK")
</pallas_src>

<mosaic_0001>
module attributes {stable_mosaic.version = 11 : i64} {
  func.func @_fused_kernel(%arg0: memref<2x35x1xf32, #tpu.memory_space<vmem>>, %arg1: memref<2x3x16xf32, #tpu.memory_space<vmem>>, %arg2: memref<35x3xf32, #tpu.memory_space<vmem>>, %arg3: memref<19x35xf32, #tpu.memory_space<vmem>>, %arg4: memref<11x19xf32, #tpu.memory_space<vmem>>, %arg5: memref<3x11xf32, #tpu.memory_space<vmem>>, %arg6: memref<3x1xf32, #tpu.memory_space<vmem>>, %arg7: memref<35x1xf32, #tpu.memory_space<vmem>>, %arg8: memref<35x1xf32, #tpu.memory_space<vmem>>, %arg9: memref<19x1xf32, #tpu.memory_space<vmem>>, %arg10: memref<19x1xf32, #tpu.memory_space<vmem>>, %arg11: memref<11x1xf32, #tpu.memory_space<vmem>>, %arg12: memref<11x1xf32, #tpu.memory_space<vmem>>, %arg13: memref<2x3x16xf32, #tpu.memory_space<vmem>>) attributes {dimension_semantics = [], scalar_prefetch = 0 : i64, scratch_operands = 0 : i64, tpu.core_type = #tpu.core_type<tc>} {
    %c0 = arith.constant 0 : index
    %c0_0 = arith.constant 0 : index
    %0 = vector.load %arg2[%c0, %c0_0] : memref<35x3xf32, #tpu.memory_space<vmem>>, vector<35x3xf32>
    %c0_1 = arith.constant 0 : index
    %c0_2 = arith.constant 0 : index
    %c0_3 = arith.constant 0 : index
    %1 = vector.load %arg1[%c0_1, %c0_2, %c0_3] : memref<2x3x16xf32, #tpu.memory_space<vmem>>, vector<1x3x16xf32>
    %2 = vector.shape_cast %1 : vector<1x3x16xf32> to vector<3x16xf32>
    %cst = arith.constant dense<0.000000e+00> : vector<35x16xf32>
    %3 = tpu.matmul %0, %2, %cst {dimension_numbers = #tpu.dot_dimension_numbers<[1], [0], [0], [1], [0, 0, 1, 1], [], []>} : vector<35x3xf32>, vector<3x16xf32>, vector<35x16xf32> -> vector<35x16xf32>
    %c0_4 = arith.constant 0 : index
    %c0_5 = arith.constant 0 : index
    %c0_6 = arith.constant 0 : index
    %4 = vector.load %arg0[%c0_4, %c0_5, %c0_6] : memref<2x35x1xf32, #tpu.memory_space<vmem>>, vector<1x35x1xf32>
    %5 = vector.shape_cast %4 : vector<1x35x1xf32> to vector<35x1xf32>
    %6 = vector.broadcast %5 : vector<35x1xf32> to vector<35x16xf32>
    %7 = arith.addf %3, %6 : vector<35x16xf32>
    %c0_7 = arith.constant 0 : index
    %c0_8 = arith.constant 0 : index
    %8 = vector.load %arg2[%c0_7, %c0_8] : memref<35x3xf32, #tpu.memory_space<vmem>>, vector<35x3xf32>
    %c1 = arith.constant 1 : index
    %c0_9 = arith.constant 0 : index
    %c0_10 = arith.constant 0 : index
    %9 = vector.load %arg1[%c1, %c0_9, %c0_10] : memref<2x3x16xf32, #tpu.memory_space<vmem>>, vector<1x3x16xf32>
    %10 = vector.shape_cast %9 : vector<1x3x16xf32> to vector<3x16xf32>
    %cst_11 = arith.constant dense<0.000000e+00> : vector<35x16xf32>
    %11 = tpu.matmul %8, %10, %cst_11 {dimension_numbers = #tpu.dot_dimension_numbers<[1], [0], [0], [1], [0, 0, 1, 1], [], []>} : vector<35x3xf32>, vector<3x16xf32>, vector<35x16xf32> -> vector<35x16xf32>
    %c1_12 = arith.constant 1 : index
    %c0_13 = arith.constant 0 : index
    %c0_14 = arith.constant 0 : index
    %12 = vector.load %arg0[%c1_12, %c0_13, %c0_14] : memref<2x35x1xf32, #tpu.memory_space<vmem>>, vector<1x35x1xf32>
    %13 = vector.shape_cast %12 : vector<1x35x1xf32> to vector<35x1xf32>
    %14 = vector.broadcast %13 : vector<35x1xf32> to vector<35x16xf32>
    %15 = arith.addf %11, %14 : vector<35x16xf32>
    %c0_15 = arith.constant 0 : index
    %c0_16 = arith.constant 0 : index
    %16 = vector.load %arg7[%c0_15, %c0_16] : memref<35x1xf32, #tpu.memory_space<vmem>>, vector<35x1xf32>
    %c0_17 = arith.constant 0 : index
    %c0_18 = arith.constant 0 : index
    %17 = vector.load %arg8[%c0_17, %c0_18] : memref<35x1xf32, #tpu.memory_space<vmem>>, vector<35x1xf32>
    %cst_19 = arith.constant dense<0.000000e+00> : vector<35xf32>
    %18 = vector.multi_reduction <add>, %7, %cst_19 [1] : vector<35x16xf32> to vector<35xf32>
    %19 = vector.shape_cast %18 : vector<35xf32> to vector<35x1xf32>
    %cst_20 = arith.constant 0.000000e+00 : f32
    %20 = vector.broadcast %cst_20 : f32 to vector<35x1xf32>
    %21 = arith.addf %20, %19 : vector<35x1xf32>
    %cst_21 = arith.constant dense<0.000000e+00> : vector<35xf32>
    %22 = vector.multi_reduction <add>, %15, %cst_21 [1] : vector<35x16xf32> to vector<35xf32>
    %23 = vector.shape_cast %22 : vector<35xf32> to vector<35x1xf32>
    %24 = arith.addf %21, %23 : vector<35x1xf32>
    %25 = arith.mulf %7, %7 : vector<35x16xf32>
    %cst_22 = arith.constant dense<0.000000e+00> : vector<35xf32>
    %26 = vector.multi_reduction <add>, %25, %cst_22 [1] : vector<35x16xf32> to vector<35xf32>
    %27 = vector.shape_cast %26 : vector<35xf32> to vector<35x1xf32>
    %cst_23 = arith.constant 0.000000e+00 : f32
    %28 = vector.broadcast %cst_23 : f32 to vector<35x1xf32>
    %29 = arith.addf %28, %27 : vector<35x1xf32>
    %30 = arith.mulf %15, %15 : vector<35x16xf32>
    %cst_24 = arith.constant dense<0.000000e+00> : vector<35xf32>
    %31 = vector.multi_reduction <add>, %30, %cst_24 [1] : vector<35x16xf32> to vector<35xf32>
    %32 = vector.shape_cast %31 : vector<35xf32> to vector<35x1xf32>
    %33 = arith.addf %29, %32 : vector<35x1xf32>
    %cst_25 = arith.constant 3.200000e+01 : f32
    %34 = vector.broadcast %cst_25 : f32 to vector<35x1xf32>
    %35 = arith.divf %24, %34 : vector<35x1xf32>
    %cst_26 = arith.constant 3.200000e+01 : f32
    %36 = vector.broadcast %cst_26 : f32 to vector<35x1xf32>
    %37 = arith.divf %33, %36 : vector<35x1xf32>
    %38 = arith.mulf %35, %35 : vector<35x1xf32>
    %39 = arith.subf %37, %38 : vector<35x1xf32>
    %cst_27 = arith.constant 0.000000e+00 : f32
    %40 = vector.broadcast %cst_27 : f32 to vector<35x1xf32>
    %41 = arith.maximumf %39, %40 : vector<35x1xf32>
    %cst_28 = arith.constant 9.99999974E-6 : f32
    %42 = vector.broadcast %cst_28 : f32 to vector<35x1xf32>
    %43 = arith.addf %41, %42 : vector<35x1xf32>
    %44 = math.rsqrt %43 : vector<35x1xf32>
    %45 = arith.mulf %16, %44 : vector<35x1xf32>
    %46 = arith.mulf %35, %45 : vector<35x1xf32>
    %47 = arith.subf %17, %46 : vector<35x1xf32>
    %48 = vector.broadcast %45 : vector<35x1xf32> to vector<35x16xf32>
    %49 = arith.mulf %7, %48 : vector<35x16xf32>
    %50 = vector.broadcast %47 : vector<35x1xf32> to vector<35x16xf32>
    %51 = arith.addf %49, %50 : vector<35x16xf32>
    %cst_29 = arith.constant 0.000000e+00 : f32
    %52 = vector.broadcast %cst_29 : f32 to vector<35x16xf32>
    %53 = arith.maximumf %51, %52 : vector<35x16xf32>
    %54 = vector.broadcast %45 : vector<35x1xf32> to vector<35x16xf32>
    %55 = arith.mulf %15, %54 : vector<35x16xf32>
    %56 = vector.broadcast %47 : vector<35x1xf32> to vector<35x16xf32>
    %57 = arith.addf %55, %56 : vector<35x16xf32>
    %cst_30 = arith.constant 0.000000e+00 : f32
    %58 = vector.broadcast %cst_30 : f32 to vector<35x16xf32>
    %59 = arith.maximumf %57, %58 : vector<35x16xf32>
    %c0_31 = arith.constant 0 : index
    %c0_32 = arith.constant 0 : index
    %60 = vector.load %arg3[%c0_31, %c0_32] : memref<19x35xf32, #tpu.memory_space<vmem>>, vector<19x35xf32>
    %cst_33 = arith.constant dense<0.000000e+00> : vector<19x16xf32>
    %61 = tpu.matmul %60, %53, %cst_33 {dimension_numbers = #tpu.dot_dimension_numbers<[1], [0], [0], [1], [0, 0, 1, 1], [], []>} : vector<19x35xf32>, vector<35x16xf32>, vector<19x16xf32> -> vector<19x16xf32>
    %c0_34 = arith.constant 0 : index
    %c0_35 = arith.constant 0 : index
    %62 = vector.load %arg3[%c0_34, %c0_35] : memref<19x35xf32, #tpu.memory_space<vmem>>, vector<19x35xf32>
    %cst_36 = arith.constant dense<0.000000e+00> : vector<19x16xf32>
    %63 = tpu.matmul %62, %59, %cst_36 {dimension_numbers = #tpu.dot_dimension_numbers<[1], [0], [0], [1], [0, 0, 1, 1], [], []>} : vector<19x35xf32>, vector<35x16xf32>, vector<19x16xf32> -> vector<19x16xf32>
    %c0_37 = arith.constant 0 : index
    %c0_38 = arith.constant 0 : index
    %64 = vector.load %arg9[%c0_37, %c0_38] : memref<19x1xf32, #tpu.memory_space<vmem>>, vector<19x1xf32>
    %c0_39 = arith.constant 0 : index
    %c0_40 = arith.constant 0 : index
    %65 = vector.load %arg10[%c0_39, %c0_40] : memref<19x1xf32, #tpu.memory_space<vmem>>, vector<19x1xf32>
    %cst_41 = arith.constant dense<0.000000e+00> : vector<19xf32>
    %66 = vector.multi_reduction <add>, %61, %cst_41 [1] : vector<19x16xf32> to vector<19xf32>
    %67 = vector.shape_cast %66 : vector<19xf32> to vector<19x1xf32>
    %cst_42 = arith.constant 0.000000e+00 : f32
    %68 = vector.broadcast %cst_42 : f32 to vector<19x1xf32>
    %69 = arith.addf %68, %67 : vector<19x1xf32>
    %cst_43 = arith.constant dense<0.000000e+00> : vector<19xf32>
    %70 = vector.multi_reduction <add>, %63, %cst_43 [1] : vector<19x16xf32> to vector<19xf32>
    %71 = vector.shape_cast %70 : vector<19xf32> to vector<19x1xf32>
    %72 = arith.addf %69, %71 : vector<19x1xf32>
    %73 = arith.mulf %61, %61 : vector<19x16xf32>
    %cst_44 = arith.constant dense<0.000000e+00> : vector<19xf32>
    %74 = vector.multi_reduction <add>, %73, %cst_44 [1] : vector<19x16xf32> to vector<19xf32>
    %75 = vector.shape_cast %74 : vector<19xf32> to vector<19x1xf32>
    %cst_45 = arith.constant 0.000000e+00 : f32
    %76 = vector.broadcast %cst_45 : f32 to vector<19x1xf32>
    %77 = arith.addf %76, %75 : vector<19x1xf32>
    %78 = arith.mulf %63, %63 : vector<19x16xf32>
    %cst_46 = arith.constant dense<0.000000e+00> : vector<19xf32>
    %79 = vector.multi_reduction <add>, %78, %cst_46 [1] : vector<19x16xf32> to vector<19xf32>
    %80 = vector.shape_cast %79 : vector<19xf32> to vector<19x1xf32>
    %81 = arith.addf %77, %80 : vector<19x1xf32>
    %cst_47 = arith.constant 3.200000e+01 : f32
    %82 = vector.broadcast %cst_47 : f32 to vector<19x1xf32>
    %83 = arith.divf %72, %82 : vector<19x1xf32>
    %cst_48 = arith.constant 3.200000e+01 : f32
    %84 = vector.broadcast %cst_48 : f32 to vector<19x1xf32>
    %85 = arith.divf %81, %84 : vector<19x1xf32>
    %86 = arith.mulf %83, %83 : vector<19x1xf32>
    %87 = arith.subf %85, %86 : vector<19x1xf32>
    %cst_49 = arith.constant 0.000000e+00 : f32
    %88 = vector.broadcast %cst_49 : f32 to vector<19x1xf32>
    %89 = arith.maximumf %87, %88 : vector<19x1xf32>
    %cst_50 = arith.constant 9.99999974E-6 : f32
    %90 = vector.broadcast %cst_50 : f32 to vector<19x1xf32>
    %91 = arith.addf %89, %90 : vector<19x1xf32>
    %92 = math.rsqrt %91 : vector<19x1xf32>
    %93 = arith.mulf %64, %92 : vector<19x1xf32>
    %94 = arith.mulf %83, %93 : vector<19x1xf32>
    %95 = arith.subf %65, %94 : vector<19x1xf32>
    %96 = vector.broadcast %93 : vector<19x1xf32> to vector<19x16xf32>
    %97 = arith.mulf %61, %96 : vector<19x16xf32>
    %98 = vector.broadcast %95 : vector<19x1xf32> to vector<19x16xf32>
    %99 = arith.addf %97, %98 : vector<19x16xf32>
    %cst_51 = arith.constant 0.000000e+00 : f32
    %100 = vector.broadcast %cst_51 : f32 to vector<19x16xf32>
    %101 = arith.maximumf %99, %100 : vector<19x16xf32>
    %102 = vector.broadcast %93 : vector<19x1xf32> to vector<19x16xf32>
    %103 = arith.mulf %63, %102 : vector<19x16xf32>
    %104 = vector.broadcast %95 : vector<19x1xf32> to vector<19x16xf32>
    %105 = arith.addf %103, %104 : vector<19x16xf32>
    %cst_52 = arith.constant 0.000000e+00 : f32
    %106 = vector.broadcast %cst_52 : f32 to vector<19x16xf32>
    %107 = arith.maximumf %105, %106 : vector<19x16xf32>
    %c0_53 = arith.constant 0 : index
    %c0_54 = arith.constant 0 : index
    %108 = vector.load %arg4[%c0_53, %c0_54] : memref<11x19xf32, #tpu.memory_space<vmem>>, vector<11x19xf32>
    %cst_55 = arith.constant dense<0.000000e+00> : vector<11x16xf32>
    %109 = tpu.matmul %108, %101, %cst_55 {dimension_numbers = #tpu.dot_dimension_numbers<[1], [0], [0], [1], [0, 0, 1, 1], [], []>} : vector<11x19xf32>, vector<19x16xf32>, vector<11x16xf32> -> vector<11x16xf32>
    %c0_56 = arith.constant 0 : index
    %c0_57 = arith.constant 0 : index
    %110 = vector.load %arg4[%c0_56, %c0_57] : memref<11x19xf32, #tpu.memory_space<vmem>>, vector<11x19xf32>
    %cst_58 = arith.constant dense<0.000000e+00> : vector<11x16xf32>
    %111 = tpu.matmul %110, %107, %cst_58 {dimension_numbers = #tpu.dot_dimension_numbers<[1], [0], [0], [1], [0, 0, 1, 1], [], []>} : vector<11x19xf32>, vector<19x16xf32>, vector<11x16xf32> -> vector<11x16xf32>
    %c0_59 = arith.constant 0 : index
    %c0_60 = arith.constant 0 : index
    %112 = vector.load %arg11[%c0_59, %c0_60] : memref<11x1xf32, #tpu.memory_space<vmem>>, vector<11x1xf32>
    %c0_61 = arith.constant 0 : index
    %c0_62 = arith.constant 0 : index
    %113 = vector.load %arg12[%c0_61, %c0_62] : memref<11x1xf32, #tpu.memory_space<vmem>>, vector<11x1xf32>
    %cst_63 = arith.constant dense<0.000000e+00> : vector<11xf32>
    %114 = vector.multi_reduction <add>, %109, %cst_63 [1] : vector<11x16xf32> to vector<11xf32>
    %115 = vector.shape_cast %114 : vector<11xf32> to vector<11x1xf32>
    %cst_64 = arith.constant 0.000000e+00 : f32
    %116 = vector.broadcast %cst_64 : f32 to vector<11x1xf32>
    %117 = arith.addf %116, %115 : vector<11x1xf32>
    %cst_65 = arith.constant dense<0.000000e+00> : vector<11xf32>
    %118 = vector.multi_reduction <add>, %111, %cst_65 [1] : vector<11x16xf32> to vector<11xf32>
    %119 = vector.shape_cast %118 : vector<11xf32> to vector<11x1xf32>
    %120 = arith.addf %117, %119 : vector<11x1xf32>
    %121 = arith.mulf %109, %109 : vector<11x16xf32>
    %cst_66 = arith.constant dense<0.000000e+00> : vector<11xf32>
    %122 = vector.multi_reduction <add>, %121, %cst_66 [1] : vector<11x16xf32> to vector<11xf32>
    %123 = vector.shape_cast %122 : vector<11xf32> to vector<11x1xf32>
    %cst_67 = arith.constant 0.000000e+00 : f32
    %124 = vector.broadcast %cst_67 : f32 to vector<11x1xf32>
    %125 = arith.addf %124, %123 : vector<11x1xf32>
    %126 = arith.mulf %111, %111 : vector<11x16xf32>
    %cst_68 = arith.constant dense<0.000000e+00> : vector<11xf32>
    %127 = vector.multi_reduction <add>, %126, %cst_68 [1] : vector<11x16xf32> to vector<11xf32>
    %128 = vector.shape_cast %127 : vector<11xf32> to vector<11x1xf32>
    %129 = arith.addf %125, %128 : vector<11x1xf32>
    %cst_69 = arith.constant 3.200000e+01 : f32
    %130 = vector.broadcast %cst_69 : f32 to vector<11x1xf32>
    %131 = arith.divf %120, %130 : vector<11x1xf32>
    %cst_70 = arith.constant 3.200000e+01 : f32
    %132 = vector.broadcast %cst_70 : f32 to vector<11x1xf32>
    %133 = arith.divf %129, %132 : vector<11x1xf32>
    %134 = arith.mulf %131, %131 : vector<11x1xf32>
    %135 = arith.subf %133, %134 : vector<11x1xf32>
    %cst_71 = arith.constant 0.000000e+00 : f32
    %136 = vector.broadcast %cst_71 : f32 to vector<11x1xf32>
    %137 = arith.maximumf %135, %136 : vector<11x1xf32>
    %cst_72 = arith.constant 9.99999974E-6 : f32
    %138 = vector.broadcast %cst_72 : f32 to vector<11x1xf32>
    %139 = arith.addf %137, %138 : vector<11x1xf32>
    %140 = math.rsqrt %139 : vector<11x1xf32>
    %141 = arith.mulf %112, %140 : vector<11x1xf32>
    %142 = arith.mulf %131, %141 : vector<11x1xf32>
    %143 = arith.subf %113, %142 : vector<11x1xf32>
    %144 = vector.broadcast %141 : vector<11x1xf32> to vector<11x16xf32>
    %145 = arith.mulf %109, %144 : vector<11x16xf32>
    %146 = vector.broadcast %143 : vector<11x1xf32> to vector<11x16xf32>
    %147 = arith.addf %145, %146 : vector<11x16xf32>
    %cst_73 = arith.constant 0.000000e+00 : f32
    %148 = vector.broadcast %cst_73 : f32 to vector<11x16xf32>
    %149 = arith.maximumf %147, %148 : vector<11x16xf32>
    %150 = vector.broadcast %141 : vector<11x1xf32> to vector<11x16xf32>
    %151 = arith.mulf %111, %150 : vector<11x16xf32>
    %152 = vector.broadcast %143 : vector<11x1xf32> to vector<11x16xf32>
    %153 = arith.addf %151, %152 : vector<11x16xf32>
    %cst_74 = arith.constant 0.000000e+00 : f32
    %154 = vector.broadcast %cst_74 : f32 to vector<11x16xf32>
    %155 = arith.maximumf %153, %154 : vector<11x16xf32>
    %c0_75 = arith.constant 0 : index
    %c0_76 = arith.constant 0 : index
    %156 = vector.load %arg5[%c0_75, %c0_76] : memref<3x11xf32, #tpu.memory_space<vmem>>, vector<3x11xf32>
    %cst_77 = arith.constant dense<0.000000e+00> : vector<3x16xf32>
    %157 = tpu.matmul %156, %149, %cst_77 {dimension_numbers = #tpu.dot_dimension_numbers<[1], [0], [0], [1], [0, 0, 1, 1], [], []>} : vector<3x11xf32>, vector<11x16xf32>, vector<3x16xf32> -> vector<3x16xf32>
    %c0_78 = arith.constant 0 : index
    %c0_79 = arith.constant 0 : index
    %158 = vector.load %arg6[%c0_78, %c0_79] : memref<3x1xf32, #tpu.memory_space<vmem>>, vector<3x1xf32>
    %159 = vector.broadcast %158 : vector<3x1xf32> to vector<3x16xf32>
    %160 = arith.addf %157, %159 : vector<3x16xf32>
    %161 = math.tanh %160 : vector<3x16xf32>
    %c0_80 = arith.constant 0 : index
    %c0_81 = arith.constant 0 : index
    %c0_82 = arith.constant 0 : index
    %162 = vector.load %arg13[%c0_80, %c0_81, %c0_82] : memref<2x3x16xf32, #tpu.memory_space<vmem>>, vector<1x3x16xf32>
    %163 = vector.shape_cast %162 : vector<1x3x16xf32> to vector<3x16xf32>
    %164 = vector.shape_cast %161 : vector<3x16xf32> to vector<1x3x16xf32>
    tpu.vector_store %arg13[%c0_80, %c0_81, %c0_82], %164 {strides = array<i32>} : memref<2x3x16xf32, #tpu.memory_space<vmem>>, vector<1x3x16xf32>,
    %c0_83 = arith.constant 0 : index
    %c0_84 = arith.constant 0 : index
    %165 = vector.load %arg5[%c0_83, %c0_84] : memref<3x11xf32, #tpu.memory_space<vmem>>, vector<3x11xf32>
    %cst_85 = arith.constant dense<0.000000e+00> : vector<3x16xf32>
    %166 = tpu.matmul %165, %155, %cst_85 {dimension_numbers = #tpu.dot_dimension_numbers<[1], [0], [0], [1], [0, 0, 1, 1], [], []>} : vector<3x11xf32>, vector<11x16xf32>, vector<3x16xf32> -> vector<3x16xf32>
    %c0_86 = arith.constant 0 : index
    %c0_87 = arith.constant 0 : index
    %167 = vector.load %arg6[%c0_86, %c0_87] : memref<3x1xf32, #tpu.memory_space<vmem>>, vector<3x1xf32>
    %168 = vector.broadcast %167 : vector<3x1xf32> to vector<3x16xf32>
    %169 = arith.addf %166, %168 : vector<3x16xf32>
    %170 = math.tanh %169 : vector<3x16xf32>
    %c1_88 = arith.constant 1 : index
    %c0_89 = arith.constant 0 : index
    %c0_90 = arith.constant 0 : index
    %171 = vector.load %arg13[%c1_88, %c0_89, %c0_90] : memref<2x3x16xf32, #tpu.memory_space<vmem>>, vector<1x3x16xf32>
    %172 = vector.shape_cast %171 : vector<1x3x16xf32> to vector<3x16xf32>
    %173 = vector.shape_cast %170 : vector<3x16xf32> to vector<1x3x16xf32>
    tpu.vector_store %arg13[%c1_88, %c0_89, %c0_90], %173 {strides = array<i32>} : memref<2x3x16xf32, #tpu.memory_space<vmem>>, vector<1x3x16xf32>,
    return
  }
}

</mosaic_0001>

<bundles_post_ra>
// kernel: point_gen_decoder.1
= control target key start
LH: loop header
LB: loop body
LE: loop exit
PB: predicated region body
PF: predicated region fallthrough
CT: control target
= control target key end

     0   :  { %vm96_vm0 = vcmask 1042432   ;;  %vm80_vm1 = vcmask 23552   ;;  %v1035_v0 = vmov 0   ;;  %vm210_vm2 = vcmask 130048   ;;  %s1493_s1 = inlined_call_operand.vmem [shape: f32[2,3,16], index: 1, kind: input, shape index: {}]   ;;  %s1494_s0 = inlined_call_operand.vmem [shape: f32[2,35,1], index: 0, kind: input, shape index: {}]   ;;  %s1495_s2 = inlined_call_operand.vmem [shape: f32[35,3], index: 2, kind: input, shape index: {}]   ;;  %s1496_s7 = inlined_call_operand.vmem [shape: f32[35,1], index: 7, kind: input, shape index: {}]   ;;  %s1497_s8 = inlined_call_operand.vmem [shape: f32[35,1], index: 8, kind: input, shape index: {}]   ;;  %s1498_s3 = inlined_call_operand.vmem [shape: f32[19,35], index: 3, kind: input, shape index: {}]   ;;  %s1499_s9 = inlined_call_operand.vmem [shape: f32[19,1], index: 9, kind: input, shape index: {}]   ;;  %s1500_s10 = inlined_call_operand.vmem [shape: f32[19,1], index: 10, kind: input, shape index: {}]   ;;  %s1501_s4 = inlined_call_operand.vmem [shape: f32[11,19], index: 4, kind: input, shape index: {}]   ;;  %s1502_s11 = inlined_call_operand.vmem [shape: f32[11,1], index: 11, kind: input, shape index: {}]   ;;  %s1503_s12 = inlined_call_operand.vmem [shape: f32[11,1], index: 12, kind: input, shape index: {}]   ;;  %s1504_s6 = inlined_call_operand.vmem [shape: f32[3,1], index: 6, kind: input, shape index: {}]   ;;  %s1505_s5 = inlined_call_operand.vmem [shape: f32[3,11], index: 5, kind: input, shape index: {}]   ;;  %s1506_s13 = inlined_call_operand.vmem [shape: f32[2,3,16], index: 13, kind: output, shape index: {}]  }
   0x1   :  { %1007 = vset.pattern.permute.xlu1 %v1035_v0  ;;  %1006 = vset.pattern.permute.xlu0 %v1035_v0  ;;  %v49_v1 = vld [vmem:[%s1493_s1] sm:$0x7]  ;;  %v973_v2 = vld [vmem:[%s1493_s1 + $0x4] sm:$0x7]  ;;  %v53_v4 = vld [vmem:[%s1494_s0 + $0x18] sm:$0xff]  ;;  %vm223_vm3 = vcmask 124928  }
   0x2   :  { %v54_v3 = vld [vmem:[%s1494_s0 + $0x20] sm:$0x7]  ;;  %967 = vmatpush.msk.msra.mxu0 %vm96_vm0, %v49_v1  ;;  %979 = vmatpush.msk.msra.mxu1 %vm96_vm0, %v973_v2  ;;  %v52_v6 = vld [vmem:[%s1494_s0 + $0x10] sm:$0xff]  ;;  %v978_v7 = vld [vmem:[%s1494_s0 + $0x48] sm:$0x7] }
   0x3   :  { %v44_v5 = vld [vmem:[%s1495_s2] sm:$0xff]  ;;  %77 = vperm.xlu0 %1006, %v54_v3   ;;  %72 = vperm.xlu1 %1007, %v53_v4   ;;  %v45_v9 = vld [vmem:[%s1495_s2 + $0x8] sm:$0xff]  ;;  %v976_v10 = vld [vmem:[%s1494_s0 + $0x38] sm:$0xff] }
   0x4   :  { %968 = vmatmul.msk.f32.vlgmr.msra.gmra.mxu0 %vm80_vm1, %v44_v5  ;;  %980 = vmatmul.msk.f32.vlgmr.msra.gmra.mxu1 %vm80_vm1, %v44_v5  ;;  %v977_v8 = vld [vmem:[%s1494_s0 + $0x40] sm:$0xff]  ;;  %v975_v11 = vld [vmem:[%s1494_s0 + $0x30] sm:$0xff]  ;;  %v51_v12 = vld [vmem:[%s1494_s0 + $0x8] sm:$0xff] }
   0x5   :  { %1008 = vset.pattern.permute.xlu2 %v1035_v0  ;;  %v46_v13 = vld [vmem:[%s1495_s2 + $0x10] sm:$0xff]  ;;  %v50_v14 = vld [vmem:[%s1494_s0] sm:$0xff]  ;;  %v974_v15 = vld [vmem:[%s1494_s0 + $0x28] sm:$0xff] }
   0x6   :  { %67 = vperm.xlu2 %1008, %v52_v6   ;;  %v47_v16 = vld [vmem:[%s1495_s2 + $0x18] sm:$0xff]  ;;  %v48_v17 = vld [vmem:[%s1495_s2 + $0x20] sm:$0x7] }
   0xb   :  { %162 = vperm.xlu0 %1006, %v978_v7   ;;  %157 = vperm.xlu1 %1007, %v977_v8  }
   0xc   :  { %969 = vmatmul.msk.f32.gmra.mxu0 %vm80_vm1, %v45_v9  ;;  %981 = vmatmul.msk.f32.gmra.mxu1 %vm80_vm1, %v45_v9 }
   0xe   :  { %152 = vperm.xlu2 %1008, %v976_v10  }
  0x13   :  { %147 = vperm.xlu1 %1007, %v975_v11   ;;  %62 = vperm.xlu0 %1006, %v51_v12  }
  0x14   :  { %970 = vmatmul.msk.f32.gmra.mxu0 %vm80_vm1, %v46_v13  ;;  %982 = vmatmul.msk.f32.gmra.mxu1 %vm80_vm1, %v46_v13 }
  0x16   :  { %57 = vperm.xlu2 %1008, %v50_v14   ;;  %v1036_v14 = vmov 32.0  }
  0x17   :  { %1009 = vrcp.f32 %v1036_v14 }
  0x1b   :  { %142 = vperm.xlu0 %1006, %v974_v15  }
  0x1c   :  { %971 = vmatmul.msk.f32.gmra.mxu0 %vm80_vm1, %v47_v16  ;;  %983 = vmatmul.msk.f32.gmra.mxu1 %vm80_vm1, %v47_v16 }
  0x24   :  { %972 = vmatmul.msk.f32.gmra.mxu0 %vm80_vm1, %v48_v17  ;;  %984 = vmatmul.msk.f32.gmra.mxu1 %vm80_vm1, %v48_v17  ;;  %v1010_v17 = vpop.eup %1009 }
  0x25   :  { %vm307_vm4 = vweird.f32 %v1010_v17 }
  0x60   :  { %v68_v18 = vpop.permute.xlu2 %67 }
  0x68   :  { %v153_v21 = vpop.permute.xlu2 %152 }
  0x70   :  { %v58_v24 = vpop.permute.xlu2 %57 }
  0x75   :  { %v78_v19 = vpop.permute.xlu0 %77  ;;  %v73_v20 = vpop.permute.xlu1 %72 }
  0x7d   :  { %v163_v22 = vpop.permute.xlu0 %162  ;;  %v158_v23 = vpop.permute.xlu1 %157 }
  0x81   :  { %v117_v25 = vpop.f32.mrf.mxu0  ;;  %v185_v26 = vpop.f32.mrf.mxu1 }
  0x82   :  { %v1170_v27 = vadd.f32 %v117_v25, %v58_v24 }
  0x84   :  { %v211_v28 = vsel %vm210_vm2, %v1170_v27, 0.0  ;;  %v252_v8 = vmul.f32 %v1170_v27, %v1170_v27 }
  0x85   :  { %v63_v29 = vpop.permute.xlu0 %62  ;;  %212 = vadd.xlane.f32.xlu2 %v211_v28  ;;  %v148_v30 = vpop.permute.xlu1 %147 }
  0x86   :  { %v257_v9 = vsel %vm210_vm2, %v252_v8, 0.0 }
  0x89   :  { %v120_v31 = vpop.f32.mrf.mxu0  ;;  %v188_v32 = vpop.f32.mrf.mxu1 }
  0x8a   :  { %v1174_v33 = vadd.f32 %v120_v31, %v63_v29  ;;  %v1176_v34 = vadd.f32 %v188_v32, %v148_v30 }
  0x8c   :  { %v214_v35 = vsel %vm210_vm2, %v1174_v33, 0.0  ;;  %v235_v36 = vsel %vm210_vm2, %v1176_v34, 0.0  ;;  %v253_v40 = vmul.f32 %v1174_v33, %v1174_v33  ;;  %v278_v11 = vmul.f32 %v1176_v34, %v1176_v34 }
  0x8d   :  { %215 = vadd.xlane.f32.xlu1 %v214_v35  ;;  %v143_v37 = vpop.permute.xlu0 %142  ;;  %236 = vadd.xlane.f32.xlu2 %v235_v36 }
  0x8e   :  { %v1182_v38 = vadd.f32 %v185_v26, %v143_v37  ;;  %v260_v44 = vsel %vm210_vm2, %v253_v40, 0.0  ;;  %v285_v13 = vsel %vm210_vm2, %v278_v11, 0.0 }
  0x90   :  { %v232_v39 = vsel %vm210_vm2, %v1182_v38, 0.0  ;;  %v277_v10 = vmul.f32 %v1182_v38, %v1182_v38 }
  0x91   :  { %v123_v41 = vpop.f32.mrf.mxu0  ;;  %v191_v42 = vpop.f32.mrf.mxu1  ;;  %233 = vadd.xlane.f32.xlu0 %v232_v39 }
  0x92   :  { %v1188_v43 = vadd.f32 %v123_v41, %v68_v18  ;;  %v1191_v45 = vadd.f32 %v191_v42, %v153_v21  ;;  %v282_v12 = vsel %vm210_vm2, %v277_v10, 0.0 }
  0x94   :  { %v217_v46 = vsel %vm210_vm2, %v1188_v43, 0.0  ;;  %v238_v51 = vsel %vm210_vm2, %v1191_v45, 0.0  ;;  %v254_v53 = vmul.f32 %v1188_v43, %v1188_v43  ;;  %v279_v55 = vmul.f32 %v1191_v45, %v1191_v45 }
  0x95   :  { %261 = vadd.xlane.f32.xlu1 %v260_v44 }
  0x96   :  { %v263_v54 = vsel %vm210_vm2, %v254_v53, 0.0  ;;  %v288_v57 = vsel %vm210_vm2, %v279_v55, 0.0 }
  0x99   :  { %v126_v47 = vpop.f32.mrf.mxu0  ;;  %v194_v48 = vpop.f32.mrf.mxu1  ;;  %218 = vadd.xlane.f32.xlu0 %v217_v46 }
  0x9a   :  { %v1195_v49 = vadd.f32 %v194_v48, %v158_v23  ;;  %v1197_v50 = vadd.f32 %v126_v47, %v73_v20 }
  0x9c   :  { %v241_v52 = vsel %vm210_vm2, %v1195_v49, 0.0  ;;  %v255_v56 = vmul.f32 %v1197_v50, %v1197_v50  ;;  %v220_v63 = vsel %vm210_vm2, %v1197_v50, 0.0  ;;  %v280_v2 = vmul.f32 %v1195_v49, %v1195_v49 }
  0x9d   :  { %239 = vadd.xlane.f32.xlu1 %v238_v51  ;;  %242 = vadd.xlane.f32.xlu2 %v241_v52 }
  0x9e   :  { %v266_v58 = vsel %vm210_vm2, %v255_v56, 0.0  ;;  %v291_v3 = vsel %vm210_vm2, %v280_v2, 0.0 }
  0xa1   :  { %264 = vadd.xlane.f32.xlu0 %v263_v54  ;;  %v129_v59 = vpop.f32.mrf.mxu0  ;;  %v197_v60 = vpop.f32.mrf.mxu1 }
  0xa2   :  { %v1212_v61 = vadd.f32 %v129_v59, %v78_v19  ;;  %v1214_v62 = vadd.f32 %v197_v60, %v163_v22  ;;  %v303_v19 = vmul.f32 32.0, %v1010_v17 }
  0xa4   :  { %v224_v0 = vsel %vm223_vm3, %v1212_v61, 0.0  ;;  %v244_v1 = vsel %vm223_vm3, %v1214_v62, 0.0  ;;  %v256_v4 = vmul.f32 %v1212_v61, %v1212_v61  ;;  %v281_v5 = vmul.f32 %v1214_v62, %v1214_v62 }
  0xa5   :  { %289 = vadd.xlane.f32.xlu1 %v288_v57  ;;  %267 = vadd.xlane.f32.xlu2 %v266_v58  ;;  %v304_v22 = vsub.f32 1.0, %v303_v19 }
  0xa6   :  { %v269_v6 = vsel %vm223_vm3, %v256_v4, 0.0  ;;  %v294_v7 = vsel %vm223_vm3, %v281_v5, 0.0 }
  0xa7   :  { %v305_v24 = vmul.f32 %v1010_v17, %v304_v22 }
  0xa9   :  { %221 = vadd.xlane.f32.xlu0 %v220_v63  ;;  %v306_v28 = vadd.f32 %v1010_v17, %v305_v24  ;;  %v202_v24 = vld [vmem:[%s1496_s7 + $0x10] sm:$0xff] }
  0xab   :  { %v1240_v31 = vsel %vm307_vm4, %v1010_v17, %v306_v28 }
  0xad   :  { %225 = vadd.xlane.f32.xlu1 %v224_v0  ;;  %245 = vadd.xlane.f32.xlu2 %v244_v1 }
  0xb1   :  { %292 = vadd.xlane.f32.xlu0 %v291_v3 }
  0xb5   :  { %270 = vadd.xlane.f32.xlu1 %v269_v6  ;;  %295 = vadd.xlane.f32.xlu2 %v294_v7 }
  0xb9   :  { %258 = vadd.xlane.f32.xlu0 %v257_v9 }
  0xbd   :  { %283 = vadd.xlane.f32.xlu1 %v282_v12  ;;  %286 = vadd.xlane.f32.xlu2 %v285_v13 }
  0xf8   :  { %v213_v15 = vpop.xlane.xlu2 %212 }
 0x100   :  { %v216_v16 = vpop.xlane.xlu1 %215  ;;  %v237_v20 = vpop.xlane.xlu2 %236 }
 0x101   :  { %v248_v2 = vadd.f32 %v237_v20, %v216_v16 }
 0x103   :  { %v1261_v11 = vmul.f32 %v1240_v31, %v248_v2 }
 0x104   :  { %v234_v18 = vpop.xlane.xlu0 %233 }
 0x105   :  { %v247_v4 = vadd.f32 %v234_v18, %v213_v15 }
 0x107   :  { %v1264_v13 = vmul.f32 %v1240_v31, %v247_v4  ;;  %v208_v4 = vld [vmem:[%s1497_s8 + $0x18] sm:$0xff] }
 0x108   :  { %v262_v21 = vpop.xlane.xlu1 %261 }
 0x10c   :  { %v219_v23 = vpop.xlane.xlu0 %218 }
 0x110   :  { %v240_v25 = vpop.xlane.xlu1 %239  ;;  %v243_v26 = vpop.xlane.xlu2 %242 }
 0x111   :  { %v249_v29 = vadd.f32 %v240_v25, %v219_v23  ;;  %v320_v23 = vmul.f32 %v1261_v11, %v1261_v11 }
 0x113   :  { %v1243_v32 = vmul.f32 %v1240_v31, %v249_v29 }
 0x114   :  { %v265_v30 = vpop.xlane.xlu0 %264 }
 0x115   :  { %v321_v39 = vmul.f32 %v1243_v32, %v1243_v32 }
 0x118   :  { %v290_v35 = vpop.xlane.xlu1 %289  ;;  %v268_v36 = vpop.xlane.xlu2 %267 }
 0x119   :  { %v299_v37 = vadd.f32 %v290_v35, %v265_v30 }
 0x11b   :  { %v316_v40 = vmul.f32 %v1240_v31, %v299_v37 }
 0x11c   :  { %v222_v41 = vpop.xlane.xlu0 %221 }
 0x11d   :  { %v326_v42 = vsub.f32 %v316_v40, %v321_v39  ;;  %v250_v46 = vadd.f32 %v243_v26, %v222_v41  ;;  %v319_v26 = vmul.f32 %v1264_v13, %v1264_v13 }
 0x11f   :  { %v331_v44 = vmax.f32 %v326_v42, 0.0  ;;  %v1249_v52 = vmul.f32 %v1240_v31, %v250_v46 }
 0x120   :  { %v226_v47 = vpop.xlane.xlu1 %225  ;;  %v246_v48 = vpop.xlane.xlu2 %245 }
 0x121   :  { %v336_v51 = vadd.f32 1e-05, %v331_v44  ;;  %v251_v53 = vadd.f32 %v246_v48, %v226_v47  ;;  %v322_v56 = vmul.f32 %v1249_v52, %v1249_v52 }
 0x123   :  { %1011 = vrsqrt.f32 %v336_v51  ;;  %v1254_v57 = vmul.f32 %v1240_v31, %v251_v53  ;;  %vm365_vm6 = vweird.f32 %v336_v51  ;;  %v207_v53 = vld [vmem:[%s1497_s8 + $0x10] sm:$0xff] }
 0x124   :  { %v293_v54 = vpop.xlane.xlu0 %292 }
 0x125   :  { %v300_v55 = vadd.f32 %v293_v54, %v268_v36  ;;  %v323_v5 = vmul.f32 %v1254_v57, %v1254_v57 }
 0x127   :  { %v317_v58 = vmul.f32 %v1240_v31, %v300_v55 }
 0x128   :  { %v271_v59 = vpop.xlane.xlu1 %270  ;;  %v296_v60 = vpop.xlane.xlu2 %295 }
 0x129   :  { %v1012_v63 = vpop.eup %1011  ;;  %v327_v0 = vsub.f32 %v317_v58, %v322_v56  ;;  %v301_v1 = vadd.f32 %v296_v60, %v271_v59  ;;  %v203_v59 = vld [vmem:[%s1496_s7 + $0x18] sm:$0xff] }
 0x12a   :  { %v360_v3 = vmul.f32 %v1012_v63, %v336_v51  ;;  %vm366_vm5 = vweird.f32 %v1012_v63 }
 0x12b   :  { %v332_v6 = vmax.f32 %v327_v0, 0.0  ;;  %v318_v7 = vmul.f32 %v1240_v31, %v301_v1  ;;  %vm367_vm7 = vmor %vm365_vm6, %vm366_vm5 }
 0x12c   :  { %v361_v8 = vmul.f32 %v1012_v63, %v360_v3  ;;  %v259_v16 = vpop.xlane.xlu0 %258 }
 0x12d   :  { %v337_v9 = vadd.f32 1e-05, %v332_v6  ;;  %v328_v10 = vsub.f32 %v318_v7, %v323_v5 }
 0x12e   :  { %v362_v12 = vmul.f32 0.5, %v361_v8 }
 0x12f   :  { %1013 = vrsqrt.f32 %v337_v9  ;;  %v333_v14 = vmax.f32 %v328_v10, 0.0  ;;  %vm375_vm9 = vweird.f32 %v337_v9 }
 0x130   :  { %v284_v15 = vpop.xlane.xlu1 %283  ;;  %v287_v17 = vpop.xlane.xlu2 %286  ;;  %v363_v18 = vsub.f32 1.5, %v362_v12 }
 0x131   :  { %v1266_v19 = vadd.f32 1e-05, %v333_v14  ;;  %v297_v20 = vadd.f32 %v284_v15, %v259_v16  ;;  %v298_v22 = vadd.f32 %v287_v17, %v262_v21 }
 0x132   :  { %v364_v25 = vmul.f32 %v1012_v63, %v363_v18 }
 0x133   :  { %1015 = vrsqrt.f32 %v1266_v19  ;;  %v314_v28 = vmul.f32 %v1240_v31, %v297_v20  ;;  %v315_v29 = vmul.f32 %v1240_v31, %v298_v22  ;;  %vm385_vm13 = vweird.f32 %v1266_v19  ;;  %v200_v20 = vld [vmem:[%s1496_s7] sm:$0xff] }
 0x134   :  { %v368_v21 = vsel %vm367_vm7, %v1012_v63, %v364_v25  ;;  %vm487_vm7 = vcmask 285696  }
 0x135   :  { %v1014_v30 = vpop.eup %1013  ;;  %v324_v35 = vsub.f32 %v314_v28, %v319_v26  ;;  %v325_v36 = vsub.f32 %v315_v29, %v320_v23  ;;  %v391_v37 = vmul.f32 %v368_v21, %v202_v24  ;;  %v201_v23 = vld [vmem:[%s1496_s7 + $0x8] sm:$0xff]  ;;  %v205_v21 = vld [vmem:[%s1497_s8] sm:$0xff] }
 0x136   :  { %v370_v39 = vmul.f32 %v1014_v30, %v337_v9  ;;  %vm376_vm8 = vweird.f32 %v1014_v30 }
 0x137   :  { %v329_v40 = vmax.f32 %v324_v35, 0.0  ;;  %v330_v41 = vmax.f32 %v325_v36, 0.0  ;;  %416 = vperm.xlu0 %1006, %v391_v37   ;;  %v396_v48 = vmul.f32 %v391_v37, %v1243_v32  ;;  %vm377_vm10 = vmor %vm375_vm9, %vm376_vm8  ;;  %v209_v37 = vld [vmem:[%s1497_s8 + $0x20] sm:$0x7] }
 0x138   :  { %v371_v42 = vmul.f32 %v1014_v30, %v370_v39 }
 0x139   :  { %v1016_v44 = vpop.eup %1015  ;;  %v334_v46 = vadd.f32 1e-05, %v329_v40  ;;  %v335_v47 = vadd.f32 1e-05, %v330_v41  ;;  %v401_v58 = vsub.f32 %v207_v53, %v396_v48  ;;  %v206_v41 = vld [vmem:[%s1497_s8 + $0x8] sm:$0xff] }
 0x13a   :  { %v380_v51 = vmul.f32 %v1016_v44, %v1266_v19  ;;  %v372_v54 = vmul.f32 0.5, %v371_v42  ;;  %vm386_vm11 = vweird.f32 %v1016_v44 }
 0x13b   :  { %1017 = vrsqrt.f32 %v334_v46  ;;  %vm387_vm14 = vmor %vm385_vm13, %vm386_vm11  ;;  %vm345_vm1 = vweird.f32 %v334_v46  ;;  %vm355_vm5 = vweird.f32 %v335_v47 }
 0x13c   :  { %v381_v55 = vmul.f32 %v1016_v44, %v380_v51  ;;  %1019 = vrsqrt.f32 %v335_v47  ;;  %v373_v56 = vsub.f32 1.5, %v372_v54 }
 0x13e   :  { %v374_v60 = vmul.f32 %v1014_v30, %v373_v56  ;;  %v382_v32 = vmul.f32 0.5, %v381_v55 }
 0x13f   :  { %446 = vperm.xlu0 %1006, %v401_v58  }
 0x140   :  { %v378_v63 = vsel %vm377_vm10, %v1014_v30, %v374_v60  ;;  %v383_v5 = vsub.f32 1.5, %v382_v32 }
 0x141   :  { %v1018_v0 = vpop.eup %1017  ;;  %v392_v1 = vmul.f32 %v378_v63, %v203_v59 }
 0x142   :  { %v1020_v2 = vpop.eup %1019  ;;  %v340_v3 = vmul.f32 %v1018_v0, %v334_v46  ;;  %v384_v14 = vmul.f32 %v1016_v44, %v383_v5  ;;  %vm346_vm12 = vweird.f32 %v1018_v0 }
 0x143   :  { %v350_v6 = vmul.f32 %v1020_v2, %v335_v47  ;;  %v397_v7 = vmul.f32 %v392_v1, %v1249_v52  ;;  %vm356_vm15 = vweird.f32 %v1020_v2  ;;  %v204_v52 = vld [vmem:[%s1496_s7 + $0x20] sm:$0x7]  ;;  %vm347_vm4 = vmor %vm345_vm1, %vm346_vm12 }
 0x144   :  { %v341_v8 = vmul.f32 %v1018_v0, %v340_v3  ;;  %v388_v18 = vsel %vm387_vm14, %v1016_v44, %v384_v14  ;;  %vm357_vm6 = vmor %vm355_vm5, %vm356_vm15 }
 0x145   :  { %v351_v10 = vmul.f32 %v1020_v2, %v350_v6  ;;  %v402_v12 = vsub.f32 %v208_v4, %v397_v7  ;;  %v393_v25 = vmul.f32 %v388_v18, %v204_v52 }
 0x146   :  { %v342_v9 = vmul.f32 0.5, %v341_v8 }
 0x147   :  { %421 = vperm.xlu0 %1006, %v392_v1   ;;  %451 = vperm.xlu2 %1008, %v402_v12   ;;  %v352_v16 = vmul.f32 0.5, %v351_v10  ;;  %v398_v36 = vmul.f32 %v393_v25, %v1254_v57 }
 0x148   :  { %v343_v15 = vsub.f32 1.5, %v342_v9 }
 0x149   :  { %v353_v17 = vsub.f32 1.5, %v352_v16  ;;  %v403_v39 = vsub.f32 %v209_v37, %v398_v36 }
 0x14a   :  { %v344_v22 = vmul.f32 %v1018_v0, %v343_v15 }
 0x14b   :  { %v354_v19 = vmul.f32 %v1020_v2, %v353_v17  ;;  %v486_v17 = vld [vmem:[%s1498_s3 + $0x10] sm:$0x7] }
 0x14c   :  { %v348_v24 = vsel %vm347_vm4, %v1018_v0, %v344_v22  ;;  %vm722_vm4 = vcmask 154624  }
 0x14d   :  { %v358_v26 = vsel %vm357_vm6, %v1020_v2, %v354_v19  ;;  %v389_v28 = vmul.f32 %v348_v24, %v200_v20 }
 0x14e   :  { %v390_v29 = vmul.f32 %v358_v26, %v201_v23 }
 0x14f   :  { %426 = vperm.xlu2 %1008, %v393_v25   ;;  %v394_v30 = vmul.f32 %v389_v28, %v1264_v13 }
 0x150   :  { %411 = vperm.xlu1 %1007, %v390_v29   ;;  %v395_v40 = vmul.f32 %v390_v29, %v1261_v11 }
 0x151   :  { %v399_v35 = vsub.f32 %v205_v21, %v394_v30 }
 0x152   :  { %v400_v42 = vsub.f32 %v206_v41, %v395_v40 }
 0x153   :  { %436 = vperm.xlu0 %1006, %v399_v35  }
 0x157   :  { %406 = vperm.xlu2 %1008, %v389_v28  }
 0x158   :  { %456 = vperm.xlu1 %1007, %v403_v39  }
 0x160   :  { %441 = vperm.xlu1 %1007, %v400_v42  }
 0x1a1   :  { %v452_v44 = vpop.permute.xlu2 %451 }
 0x1a9   :  { %v417_v13 = vpop.permute.xlu0 %416  ;;  %v427_v47 = vpop.permute.xlu2 %426 }
 0x1aa   :  { %v433_v54 = vmul.f32 %v427_v47, %v1212_v61  ;;  %v473_v11 = vmul.f32 %v427_v47, %v1214_v62  ;;  %v431_v55 = vmul.f32 %v417_v13, %v1188_v43  ;;  %v471_v56 = vmul.f32 %v417_v13, %v1191_v45 }
 0x1b1   :  { %v447_v46 = vpop.permute.xlu0 %446  ;;  %v407_v2 = vpop.permute.xlu2 %406 }
 0x1b2   :  { %v461_v0 = vadd.f32 %v447_v46, %v431_v55  ;;  %v476_v1 = vadd.f32 %v471_v56, %v447_v46  ;;  %v429_v43 = vmul.f32 %v407_v2, %v1170_v27  ;;  %v469_v45 = vmul.f32 %v407_v2, %v1182_v38 }
 0x1b4   :  { %v466_v6 = vmax.f32 %v461_v0, 0.0  ;;  %v481_v7 = vmax.f32 %v476_v1, 0.0 }
 0x1b9   :  { %v422_v48 = vpop.permute.xlu0 %421 }
 0x1ba   :  { %v432_v51 = vmul.f32 %v422_v48, %v1197_v50  ;;  %v472_v53 = vmul.f32 %v422_v48, %v1195_v49 }
 0x1bc   :  { %v462_v32 = vadd.f32 %v452_v44, %v432_v51  ;;  %v477_v63 = vadd.f32 %v472_v53, %v452_v44 }
 0x1be   :  { %v467_v49 = vmax.f32 %v462_v32, 0.0  ;;  %v482_v61 = vmax.f32 %v477_v63, 0.0 }
 0x1c2   :  { %v412_v57 = vpop.permute.xlu1 %411 }
 0x1c3   :  { %v430_v62 = vmul.f32 %v412_v57, %v1174_v33  ;;  %v470_v5 = vmul.f32 %v412_v57, %v1176_v34  ;;  %v484_v33 = vld [vmem:[%s1498_s3] sm:$0xff]  ;;  %v485_v34 = vld [vmem:[%s1498_s3 + $0x8] sm:$0xff] }
 0x1c5   :  { %v437_v4 = vpop.permute.xlu0 %436 }
 0x1c6   :  { %v459_v8 = vadd.f32 %v437_v4, %v429_v43  ;;  %v474_v12 = vadd.f32 %v469_v45, %v437_v4 }
 0x1c8   :  { %v464_v27 = vmax.f32 %v459_v8, 0.0  ;;  %v479_v38 = vmax.f32 %v474_v12, 0.0 }
 0x1ca   :  { %v457_v58 = vpop.permute.xlu1 %456 }
 0x1cb   :  { %v463_v59 = vadd.f32 %v457_v58, %v433_v54  ;;  %v478_v60 = vadd.f32 %v473_v11, %v457_v58 }
 0x1cd   :  { %v468_v3 = vmax.f32 %v463_v59, 0.0  ;;  %v483_v50 = vmax.f32 %v478_v60, 0.0 }
 0x1cf   :  { %985 = vmatpush.msk.msra.mxu2 %vm96_vm0, %v468_v3  ;;  %989 = vmatpush.msk.msra.mxu3 %vm96_vm0, %v483_v50 }
 0x1d1   :  { %512 = vmatpush.msra.mxu2 %v467_v49  ;;  %541 = vmatpush.msra.mxu3 %v482_v61 }
 0x1d2   :  { %v442_v10 = vpop.permute.xlu1 %441 }
 0x1d3   :  { %v460_v9 = vadd.f32 %v442_v10, %v430_v62  ;;  %v475_v14 = vadd.f32 %v470_v5, %v442_v10  ;;  %513 = vmatpush.msra.mxu2 %v466_v6  ;;  %542 = vmatpush.msra.mxu3 %v481_v7 }
 0x1d5   :  { %v465_v16 = vmax.f32 %v460_v9, 0.0  ;;  %v480_v15 = vmax.f32 %v475_v14, 0.0 }
 0x1d7   :  { %514 = vmatpush.msra.mxu2 %v465_v16  ;;  %543 = vmatpush.msra.mxu3 %v480_v15 }
 0x1d9   :  { %515 = vmatpush.msra.mxu2 %v464_v27  ;;  %544 = vmatpush.msra.mxu3 %v479_v38 }
 0x1da   :  { %986 = vmatmul.msk.f32.vlgmr.msra.gmra.mxu2 %vm487_vm7, %v484_v33  ;;  %990 = vmatmul.msk.f32.vlgmr.msra.gmra.mxu3 %vm487_vm7, %v484_v33 }
 0x1e2   :  { %987 = vmatmul.msk.f32.gmra.mxu2 %vm487_vm7, %v485_v34  ;;  %991 = vmatmul.msk.f32.gmra.mxu3 %vm487_vm7, %v485_v34 }
 0x1ea   :  { %988 = vmatmul.msk.f32.gmra.mxu2 %vm487_vm7, %v486_v17  ;;  %992 = vmatmul.msk.f32.gmra.mxu3 %vm487_vm7, %v486_v17 }
 0x25d   :  { %v1333_v52 = vpop.f32.mrf.mxu2  ;;  %v1335_v18 = vpop.f32.mrf.mxu3 }
 0x25e   :  { %v573_v20 = vsel %vm210_vm2, %v1335_v18, 0.0  ;;  %v561_v22 = vsel %vm210_vm2, %v1333_v52, 0.0  ;;  %v600_v13 = vmul.f32 %v1335_v18, %v1335_v18  ;;  %v585_v44 = vmul.f32 %v1333_v52, %v1333_v52 }
 0x25f   :  { %574 = vadd.xlane.f32.xlu1 %v573_v20  ;;  %562 = vadd.xlane.f32.xlu2 %v561_v22 }
 0x260   :  { %v603_v46 = vsel %vm210_vm2, %v600_v13, 0.0  ;;  %v588_v57 = vsel %vm210_vm2, %v585_v44, 0.0 }
 0x265   :  { %v1341_v23 = vpop.f32.mrf.mxu2  ;;  %v1343_v19 = vpop.f32.mrf.mxu3 }
 0x266   :  { %v576_v24 = vsel %vm210_vm2, %v1343_v19, 0.0  ;;  %v564_v25 = vsel %vm210_vm2, %v1341_v23, 0.0  ;;  %v586_v26 = vmul.f32 %v1341_v23, %v1341_v23  ;;  %v601_v39 = vmul.f32 %v1343_v19, %v1343_v19 }
 0x267   :  { %577 = vadd.xlane.f32.xlu2 %v576_v24  ;;  %565 = vadd.xlane.f32.xlu0 %v564_v25 }
 0x268   :  { %v591_v30 = vsel %vm210_vm2, %v586_v26, 0.0  ;;  %v606_v42 = vsel %vm210_vm2, %v601_v39, 0.0 }
 0x26d   :  { %v1351_v28 = vpop.f32.mrf.mxu2  ;;  %v1353_v29 = vpop.f32.mrf.mxu3 }
 0x26e   :  { %v579_v21 = vsel %vm223_vm3, %v1353_v29, 0.0  ;;  %v567_v35 = vsel %vm223_vm3, %v1351_v28, 0.0  ;;  %v587_v36 = vmul.f32 %v1351_v28, %v1351_v28  ;;  %v602_v37 = vmul.f32 %v1353_v29, %v1353_v29 }
 0x26f   :  { %580 = vadd.xlane.f32.xlu1 %v579_v21  ;;  %592 = vadd.xlane.f32.xlu0 %v591_v30 }
 0x270   :  { %568 = vadd.xlane.f32.xlu2 %v567_v35  ;;  %v594_v40 = vsel %vm223_vm3, %v587_v36, 0.0  ;;  %v609_v41 = vsel %vm223_vm3, %v602_v37, 0.0  ;;  %v557_v37 = vld [vmem:[%s1499_s9 + $0x10] sm:$0x7] }
 0x277   :  { %610 = vadd.xlane.f32.xlu0 %v609_v41  ;;  %595 = vadd.xlane.f32.xlu1 %v594_v40  ;;  %v556_v40 = vld [vmem:[%s1499_s9 + $0x8] sm:$0xff] }
 0x278   :  { %607 = vadd.xlane.f32.xlu2 %v606_v42 }
 0x27f   :  { %604 = vadd.xlane.f32.xlu0 %v603_v46  ;;  %589 = vadd.xlane.f32.xlu1 %v588_v57 }
 0x2d2   :  { %v563_v47 = vpop.xlane.xlu2 %562  ;;  %v575_v48 = vpop.xlane.xlu1 %574 }
 0x2d3   :  { %v582_v3 = vadd.f32 %v575_v48, %v563_v47  ;;  %v560_v47 = vld [vmem:[%s1500_s10 + $0x10] sm:$0x7] }
 0x2d5   :  { %v1384_v62 = vmul.f32 %v582_v3, %v1240_v31 }
 0x2d7   :  { %v621_v14 = vmul.f32 %v1384_v62, %v1384_v62 }
 0x2da   :  { %v578_v51 = vpop.xlane.xlu2 %577  ;;  %v566_v53 = vpop.xlane.xlu0 %565 }
 0x2db   :  { %v583_v58 = vadd.f32 %v578_v51, %v566_v53 }
 0x2dd   :  { %v1377_v60 = vmul.f32 %v583_v58, %v1240_v31 }
 0x2df   :  { %v622_v49 = vmul.f32 %v1377_v60, %v1377_v60 }
 0x2e2   :  { %v581_v54 = vpop.xlane.xlu1 %580  ;;  %v593_v11 = vpop.xlane.xlu0 %592 }
 0x2e3   :  { %v569_v55 = vpop.xlane.xlu2 %568 }
 0x2e4   :  { %v584_v56 = vadd.f32 %v581_v54, %v569_v55 }
 0x2e6   :  { %v617_v59 = vmul.f32 %v584_v56, %v1240_v31 }
 0x2e8   :  { %v623_v50 = vmul.f32 %v617_v59, %v617_v59 }
 0x2ea   :  { %v611_v32 = vpop.xlane.xlu0 %610  ;;  %v596_v63 = vpop.xlane.xlu1 %595 }
 0x2eb   :  { %v614_v0 = vadd.f32 %v611_v32, %v596_v63  ;;  %v608_v1 = vpop.xlane.xlu2 %607  ;;  %v559_v63 = vld [vmem:[%s1500_s10 + $0x8] sm:$0xff] }
 0x2ec   :  { %v613_v2 = vadd.f32 %v608_v1, %v593_v11  ;;  %v555_v11 = vld [vmem:[%s1499_s9] sm:$0xff] }
 0x2ed   :  { %v620_v4 = vmul.f32 %v614_v0, %v1240_v31 }
 0x2ee   :  { %v619_v61 = vmul.f32 %v613_v2, %v1240_v31 }
 0x2ef   :  { %v626_v43 = vsub.f32 %v620_v4, %v623_v50 }
 0x2f0   :  { %v625_v45 = vsub.f32 %v619_v61, %v622_v49 }
 0x2f1   :  { %v629_v5 = vmax.f32 %v626_v43, 0.0 }
 0x2f2   :  { %v628_v6 = vmax.f32 %v625_v45, 0.0  ;;  %v605_v7 = vpop.xlane.xlu0 %604  ;;  %v590_v8 = vpop.xlane.xlu1 %589 }
 0x2f3   :  { %v632_v10 = vadd.f32 1e-05, %v629_v5  ;;  %v612_v12 = vadd.f32 %v605_v7, %v590_v8 }
 0x2f4   :  { %v631_v9 = vadd.f32 1e-05, %v628_v6 }
 0x2f5   :  { %1021 = vrsqrt.f32 %v632_v10  ;;  %v618_v16 = vmul.f32 %v612_v12, %v1240_v31  ;;  %vm659_vm10 = vweird.f32 %v632_v10 }
 0x2f6   :  { %1023 = vrsqrt.f32 %v631_v9  ;;  %vm649_vm12 = vweird.f32 %v631_v9 }
 0x2f7   :  { %v624_v15 = vsub.f32 %v618_v16, %v621_v14 }
 0x2f9   :  { %v627_v27 = vmax.f32 %v624_v15, 0.0 }
 0x2fb   :  { %v1022_v38 = vpop.eup %1021  ;;  %v630_v33 = vadd.f32 1e-05, %v627_v27 }
 0x2fc   :  { %v1024_v34 = vpop.eup %1023  ;;  %v654_v17 = vmul.f32 %v1022_v38, %v632_v10  ;;  %vm660_vm8 = vweird.f32 %v1022_v38 }
 0x2fd   :  { %v644_v20 = vmul.f32 %v1024_v34, %v631_v9  ;;  %1025 = vrsqrt.f32 %v630_v33  ;;  %vm650_vm9 = vweird.f32 %v1024_v34  ;;  %vm661_vm11 = vmor %vm659_vm10, %vm660_vm8  ;;  %vm639_vm15 = vweird.f32 %v630_v33 }
 0x2fe   :  { %v655_v22 = vmul.f32 %v1022_v38, %v654_v17  ;;  %vm651_vm13 = vmor %vm649_vm12, %vm650_vm9  ;;  %vm898_vm10 = vcmask 89088  }
 0x2ff   :  { %v645_v24 = vmul.f32 %v1024_v34, %v644_v20 }
 0x300   :  { %v656_v25 = vmul.f32 0.5, %v655_v22 }
 0x301   :  { %v646_v26 = vmul.f32 0.5, %v645_v24 }
 0x302   :  { %v657_v21 = vsub.f32 1.5, %v656_v25 }
 0x303   :  { %v1026_v30 = vpop.eup %1025  ;;  %v647_v35 = vsub.f32 1.5, %v646_v26 }
 0x304   :  { %v634_v36 = vmul.f32 %v1026_v30, %v630_v33  ;;  %v658_v39 = vmul.f32 %v1022_v38, %v657_v21  ;;  %vm640_vm14 = vweird.f32 %v1026_v30 }
 0x305   :  { %v648_v41 = vmul.f32 %v1024_v34, %v647_v35  ;;  %vm641_vm1 = vmor %vm639_vm15, %vm640_vm14 }
 0x306   :  { %v635_v42 = vmul.f32 %v1026_v30, %v634_v36  ;;  %v662_v13 = vsel %vm661_vm11, %v1022_v38, %v658_v39 }
 0x307   :  { %v665_v44 = vmul.f32 %v662_v13, %v557_v37  ;;  %v652_v46 = vsel %vm651_vm13, %v1024_v34, %v648_v41 }
 0x308   :  { %v664_v57 = vmul.f32 %v652_v46, %v556_v40  ;;  %v636_v48 = vmul.f32 0.5, %v635_v42 }
 0x309   :  { %684 = vperm.xlu2 %1008, %v665_v44   ;;  %v668_v51 = vmul.f32 %v665_v44, %v617_v59  ;;  %v558_v59 = vld [vmem:[%s1500_s10] sm:$0xff] }
 0x30a   :  { %679 = vperm.xlu1 %1007, %v664_v57   ;;  %v637_v53 = vsub.f32 1.5, %v636_v48  ;;  %v667_v32 = vmul.f32 %v664_v57, %v1377_v60 }
 0x30b   :  { %v671_v54 = vsub.f32 %v560_v47, %v668_v51 }
 0x30c   :  { %v638_v55 = vmul.f32 %v1026_v30, %v637_v53  ;;  %v670_v2 = vsub.f32 %v559_v63, %v667_v32 }
 0x30d   :  { %702 = vperm.xlu0 %1006, %v671_v54  }
 0x30e   :  { %v642_v56 = vsel %vm641_vm1, %v1026_v30, %v638_v55 }
 0x30f   :  { %v663_v58 = vmul.f32 %v642_v56, %v555_v11 }
 0x311   :  { %674 = vperm.xlu2 %1008, %v663_v58   ;;  %v666_v0 = vmul.f32 %v663_v58, %v1384_v62 }
 0x313   :  { %v669_v1 = vsub.f32 %v558_v59, %v666_v0 }
 0x315   :  { %692 = vperm.xlu1 %1007, %v669_v1   ;;  %697 = vperm.xlu0 %1006, %v670_v2  }
 0x363   :  { %v685_v3 = vpop.permute.xlu2 %684 }
 0x364   :  { %v689_v50 = vmul.f32 %v685_v3, %v1351_v28  ;;  %v713_v60 = vmul.f32 %v685_v3, %v1353_v29 }
 0x36b   :  { %v675_v6 = vpop.permute.xlu2 %674 }
 0x36c   :  { %v687_v62 = vmul.f32 %v675_v6, %v1333_v52  ;;  %v711_v7 = vmul.f32 %v675_v6, %v1335_v18  ;;  %v720_v52 = vld [vmem:[%s1501_s4] sm:$0xff]  ;;  %v721_v18 = vld [vmem:[%s1501_s4 + $0x8] sm:$0x7] }
 0x37c   :  { %v680_v4 = vpop.permute.xlu1 %679 }
 0x37d   :  { %v688_v8 = vmul.f32 %v680_v4, %v1341_v23  ;;  %v712_v28 = vmul.f32 %v680_v4, %v1343_v19 }
 0x37f   :  { %v703_v49 = vpop.permute.xlu0 %702 }
 0x380   :  { %v707_v61 = vadd.f32 %v703_v49, %v689_v50  ;;  %v716_v43 = vadd.f32 %v713_v60, %v703_v49 }
 0x382   :  { %v710_v45 = vmax.f32 %v707_v61, 0.0  ;;  %v719_v5 = vmax.f32 %v716_v43, 0.0 }
 0x384   :  { %993 = vmatpush.msk.msrb.mxu2 %vm96_vm0, %v710_v45  ;;  %996 = vmatpush.msk.msrb.mxu3 %vm96_vm0, %v719_v5 }
 0x387   :  { %v693_v29 = vpop.permute.xlu1 %692  ;;  %v698_v10 = vpop.permute.xlu0 %697 }
 0x388   :  { %v705_v12 = vadd.f32 %v693_v29, %v687_v62  ;;  %v714_v9 = vadd.f32 %v711_v7, %v693_v29  ;;  %v706_v14 = vadd.f32 %v698_v10, %v688_v8  ;;  %v715_v16 = vadd.f32 %v712_v28, %v698_v10  ;;  %v782_v62 = vld [vmem:[%s1502_s11 + $0x8] sm:$0x7] }
 0x389   :  { %v784_v29 = vld [vmem:[%s1503_s12 + $0x8] sm:$0x7] }
 0x38a   :  { %v709_v15 = vmax.f32 %v706_v14, 0.0  ;;  %v718_v27 = vmax.f32 %v715_v16, 0.0  ;;  %v708_v38 = vmax.f32 %v705_v12, 0.0  ;;  %v717_v33 = vmax.f32 %v714_v9, 0.0  ;;  %v781_v16 = vld [vmem:[%s1502_s11] sm:$0xff] }
 0x38c   :  { %746 = vmatpush.msrb.mxu2 %v709_v15  ;;  %772 = vmatpush.msrb.mxu3 %v718_v27 }
 0x38e   :  { %747 = vmatpush.msrb.mxu2 %v708_v38  ;;  %773 = vmatpush.msrb.mxu3 %v717_v33  ;;  %v783_v33 = vld [vmem:[%s1503_s12] sm:$0xff] }
 0x38f   :  { %994 = vmatmul.msk.f32.vlgmr.msrb.gmra.mxu2 %vm722_vm4, %v720_v52  ;;  %997 = vmatmul.msk.f32.vlgmr.msrb.gmra.mxu3 %vm722_vm4, %v720_v52 }
 0x397   :  { %995 = vmatmul.msk.f32.gmra.mxu2 %vm722_vm4, %v721_v18  ;;  %998 = vmatmul.msk.f32.gmra.mxu3 %vm722_vm4, %v721_v18  ;;  %v892_v18 = vld [vmem:[%s1504_s6] sm:$0x7] }
 0x412   :  { %v1423_v23 = vpop.f32.mrf.mxu2  ;;  %v1425_v19 = vpop.f32.mrf.mxu3 }
 0x413   :  { %v793_v34 = vsel %vm210_vm2, %v1425_v19, 0.0  ;;  %v785_v17 = vsel %vm210_vm2, %v1423_v23, 0.0  ;;  %v801_v35 = vmul.f32 %v1423_v23, %v1423_v23  ;;  %v811_v39 = vmul.f32 %v1425_v19, %v1425_v19 }
 0x414   :  { %794 = vadd.xlane.f32.xlu2 %v793_v34  ;;  %786 = vadd.xlane.f32.xlu1 %v785_v17  ;;  %v928_v17 = vld [vmem:[%s1504_s6] sm:$0x7] }
 0x415   :  { %v803_v37 = vsel %vm210_vm2, %v801_v35, 0.0  ;;  %v813_v40 = vsel %vm210_vm2, %v811_v39, 0.0 }
 0x41a   :  { %v1431_v20 = vpop.f32.mrf.mxu2  ;;  %v1433_v22 = vpop.f32.mrf.mxu3 }
 0x41b   :  { %v812_v24 = vmul.f32 %v1433_v22, %v1433_v22  ;;  %v796_v25 = vsel %vm223_vm3, %v1433_v22, 0.0  ;;  %v788_v26 = vsel %vm223_vm3, %v1431_v20, 0.0  ;;  %v802_v21 = vmul.f32 %v1431_v20, %v1431_v20 }
 0x41c   :  { %797 = vadd.xlane.f32.xlu0 %v796_v25  ;;  %789 = vadd.xlane.f32.xlu2 %v788_v26 }
 0x41d   :  { %v816_v30 = vsel %vm223_vm3, %v812_v24, 0.0  ;;  %v806_v36 = vsel %vm223_vm3, %v802_v21, 0.0 }
 0x41e   :  { %817 = vadd.xlane.f32.xlu1 %v816_v30 }
 0x424   :  { %807 = vadd.xlane.f32.xlu0 %v806_v36  ;;  %804 = vadd.xlane.f32.xlu2 %v803_v37 }
 0x42c   :  { %814 = vadd.xlane.f32.xlu0 %v813_v40 }
 0x487   :  { %v795_v41 = vpop.xlane.xlu2 %794  ;;  %v787_v42 = vpop.xlane.xlu1 %786 }
 0x488   :  { %v799_v53 = vadd.f32 %v795_v41, %v787_v42 }
 0x48a   :  { %v821_v56 = vmul.f32 %v799_v53, %v1240_v31 }
 0x48c   :  { %v825_v1 = vmul.f32 %v821_v56, %v821_v56 }
 0x48f   :  { %v798_v13 = vpop.xlane.xlu0 %797  ;;  %v790_v44 = vpop.xlane.xlu2 %789 }
 0x490   :  { %v800_v46 = vadd.f32 %v798_v13, %v790_v44 }
 0x491   :  { %v818_v47 = vpop.xlane.xlu1 %817 }
 0x492   :  { %v822_v57 = vmul.f32 %v800_v46, %v1240_v31 }
 0x494   :  { %v826_v54 = vmul.f32 %v822_v57, %v822_v57 }
 0x497   :  { %v808_v48 = vpop.xlane.xlu0 %807  ;;  %v805_v32 = vpop.xlane.xlu2 %804 }
 0x498   :  { %v820_v51 = vadd.f32 %v818_v47, %v808_v48 }
 0x49a   :  { %v824_v11 = vmul.f32 %v820_v51, %v1240_v31 }
 0x49c   :  { %v828_v55 = vsub.f32 %v824_v11, %v826_v54 }
 0x49e   :  { %v830_v58 = vmax.f32 %v828_v55, 0.0 }
 0x49f   :  { %v815_v59 = vpop.xlane.xlu0 %814 }
 0x4a0   :  { %v832_v63 = vadd.f32 1e-05, %v830_v58  ;;  %v819_v0 = vadd.f32 %v815_v59, %v805_v32 }
 0x4a2   :  { %1027 = vrsqrt.f32 %v832_v63  ;;  %v823_v2 = vmul.f32 %v819_v0, %v1240_v31  ;;  %vm849_vm5 = vweird.f32 %v832_v63 }
 0x4a4   :  { %v827_v3 = vsub.f32 %v823_v2, %v825_v1 }
 0x4a6   :  { %v829_v50 = vmax.f32 %v827_v3, 0.0 }
 0x4a8   :  { %v1028_v60 = vpop.eup %1027  ;;  %v831_v4 = vadd.f32 1e-05, %v829_v50 }
 0x4a9   :  { %v844_v49 = vmul.f32 %v1028_v60, %v832_v63  ;;  %vm850_vm2 = vweird.f32 %v1028_v60 }
 0x4aa   :  { %1029 = vrsqrt.f32 %v831_v4  ;;  %vm851_vm6 = vmor %vm849_vm5, %vm850_vm2  ;;  %vm839_vm8 = vweird.f32 %v831_v4 }
 0x4ab   :  { %v845_v61 = vmul.f32 %v1028_v60, %v844_v49 }
 0x4ad   :  { %v846_v43 = vmul.f32 0.5, %v845_v61 }
 0x4af   :  { %v847_v45 = vsub.f32 1.5, %v846_v43 }
 0x4b0   :  { %v1030_v5 = vpop.eup %1029 }
 0x4b1   :  { %v834_v6 = vmul.f32 %v1030_v5, %v831_v4  ;;  %v848_v7 = vmul.f32 %v1028_v60, %v847_v45  ;;  %vm840_vm7 = vweird.f32 %v1030_v5 }
 0x4b2   :  { %vm841_vm9 = vmor %vm839_vm8, %vm840_vm7 }
 0x4b3   :  { %v835_v31 = vmul.f32 %v1030_v5, %v834_v6  ;;  %v852_v8 = vsel %vm851_vm6, %v1028_v60, %v848_v7 }
 0x4b4   :  { %v854_v28 = vmul.f32 %v852_v8, %v782_v62 }
 0x4b5   :  { %v836_v10 = vmul.f32 0.5, %v835_v31 }
 0x4b6   :  { %866 = vperm.xlu1 %1007, %v854_v28   ;;  %v856_v12 = vmul.f32 %v854_v28, %v822_v57  ;;  %v927_v57 = vld [vmem:[%s1505_s5] sm:$0x7] }
 0x4b7   :  { %v837_v9 = vsub.f32 1.5, %v836_v10 }
 0x4b8   :  { %v858_v14 = vsub.f32 %v784_v29, %v856_v12 }
 0x4b9   :  { %v838_v15 = vmul.f32 %v1030_v5, %v837_v9 }
 0x4ba   :  { %878 = vperm.xlu0 %1006, %v858_v14  }
 0x4bb   :  { %v842_v27 = vsel %vm841_vm9, %v1030_v5, %v838_v15 }
 0x4bc   :  { %v853_v38 = vmul.f32 %v842_v27, %v781_v16 }
 0x4be   :  { %861 = vperm.xlu2 %1008, %v853_v38   ;;  %v855_v52 = vmul.f32 %v853_v38, %v821_v56 }
 0x4c0   :  { %v857_v34 = vsub.f32 %v783_v33, %v855_v52 }
 0x4c2   :  { %895 = vperm.xlu0 %1006, %v892_v18   ;;  %873 = vperm.xlu1 %1007, %v857_v34  }
 0x4c6   :  { %931 = vperm.xlu2 %1008, %v928_v17  }
 0x518   :  { %v862_v39 = vpop.permute.xlu2 %861 }
 0x519   :  { %v869_v40 = vmul.f32 %v862_v39, %v1423_v23  ;;  %v885_v41 = vmul.f32 %v862_v39, %v1425_v19 }
 0x520   :  { %v932_v23 = vpop.permute.xlu2 %931 }
 0x528   :  { %v867_v24 = vpop.permute.xlu1 %866 }
 0x529   :  { %v870_v25 = vmul.f32 %v867_v24, %v1431_v20  ;;  %v886_v26 = vmul.f32 %v867_v24, %v1433_v22  ;;  %v891_v20 = vld [vmem:[%s1505_s5] sm:$0x7] }
 0x52c   :  { %v879_v21 = vpop.permute.xlu0 %878 }
 0x52d   :  { %v882_v30 = vadd.f32 %v879_v21, %v870_v25  ;;  %v888_v35 = vadd.f32 %v886_v26, %v879_v21 }
 0x52f   :  { %v884_v36 = vmax.f32 %v882_v30, 0.0  ;;  %v890_v37 = vmax.f32 %v888_v35, 0.0 }
 0x531   :  { %999 = vmatpush.msk.msrb.mxu0 %vm96_vm0, %v884_v36  ;;  %1001 = vmatpush.msk.msrb.mxu1 %vm96_vm0, %v890_v37 }
 0x534   :  { %v874_v42 = vpop.permute.xlu1 %873  ;;  %v896_v19 = vpop.permute.xlu0 %895 }
 0x535   :  { %v881_v13 = vadd.f32 %v874_v42, %v869_v40  ;;  %v887_v44 = vadd.f32 %v885_v41, %v874_v42 }
 0x537   :  { %v883_v22 = vmax.f32 %v881_v13, 0.0  ;;  %v889_v46 = vmax.f32 %v887_v44, 0.0 }
 0x539   :  { %920 = vmatpush.msrb.mxu0 %v883_v22  ;;  %955 = vmatpush.msrb.mxu1 %v889_v46 }
 0x53a   :  { %1000 = vmatmul.msk.f32.vlgmr.msrb.gmra.mxu0 %vm898_vm10, %v891_v20  ;;  %1002 = vmatmul.msk.f32.vlgmr.msrb.gmra.mxu1 %vm898_vm10, %v927_v57 }
 0x5b7   :  { %v922_v47 = vpop.f32.mrf.mxu0  ;;  %v957_v48 = vpop.f32.mrf.mxu1 }
 0x5b8   :  { %v923_v51 = vadd.f32 %v922_v47, %v896_v19  ;;  %v958_v53 = vadd.f32 %v957_v48, %v932_v23 }
 0x5ba   :  { %1031 = vtanh.f32 %v923_v51 }
 0x5bb   :  { %1033 = vtanh.f32 %v958_v53 }
 0x5c0   :  { %v1032_v54 = vpop.eup %1031 }
 0x5c1   :  { %v1034_v11 = vpop.eup %1033  ;;  %926 = vst.msk [vmem:[%s1506_s13] sm:$0x7] %vm223_vm3, %v1032_v54 }
 0x5c2   :  { %1003 = vst.msk [vmem:[%s1506_s13 + $0x4] sm:$0x7] %vm223_vm3, %v1034_v11 }

</bundles_post_ra>
